<compile_context>
chip_gen: v5e
topology: v5e:2x2
jax: 0.10.0
libtpu: 0.0.40
codegen_flags: <defaults>
</compile_context>

<pallas_src>
import functools

import jax
import jax.numpy as jnp
from jax.experimental import pallas as pl
from jax.experimental.pallas import tpu as pltpu


def _msr_kernel(x_ref, pe_ref, dm_ref, wq_ref, wk_ref, wv_ref, wo_ref, o_ref,
                *, num_heads, head_dim):
    gb, g, d = x_ref.shape
    hd = head_dim
    rows = gb * g
    in_dtype = x_ref.dtype

    # Flatten groups into the sublane (row) dimension for dense matmuls.
    x = x_ref[...].reshape(rows, d)
    xpe = (x + pe_ref[...].reshape(rows, d)).astype(in_dtype)

    # Full-width projections (single MXU matmuls, N = d, K = d).
    # k-scaling is folded into Wk on the host.
    q = jnp.dot(xpe, wq_ref[...],
                preferred_element_type=jnp.float32).astype(in_dtype)
    k = jnp.dot(xpe, wk_ref[...],
                preferred_element_type=jnp.float32).astype(in_dtype)
    v = jnp.dot(x, wv_ref[...],
                preferred_element_type=jnp.float32).astype(in_dtype)

    dm = dm_ref[...].astype(jnp.float32)                       # (gb, h, g, g)

    # Per-head attention: small static loop, all slices are static offsets.
    head_outs = []
    for hh in range(num_heads):
        c0 = hh * hd
        qh = q[:, c0:c0 + hd].reshape(gb, g, hd)
        kh = k[:, c0:c0 + hd].reshape(gb, g, hd)
        vh = v[:, c0:c0 + hd].reshape(gb, g, hd)

        # Scores + float32 softmax numerator (einsum contracts the last dims
        # of q and k directly -> no in-kernel transpose).
        s = jnp.einsum("bqc,bkc->bqk", qh, kh,
                       preferred_element_type=jnp.float32)
        s = s - jnp.max(s, axis=-1, keepdims=True)
        p = jnp.exp(s)
        l = jnp.sum(p, axis=-1, keepdims=True)                 # (gb, g, 1)

        # Decay-mask gating on unnormalized probabilities; normalization is
        # deferred past the PV matmul (row-scalar, exact math).
        pg = (p * dm[:, hh]).astype(in_dtype)
        oh = jnp.einsum("bqk,bkc->bqc", pg, vh,
                        preferred_element_type=jnp.float32)
        # Exact reciprocal keeps float32 bit-faithfulness; approx=True (EUP)
        # is a valid perf knob if looser tolerance is acceptable.
        oh = oh * pl.reciprocal(l, approx=False)
        head_outs.append(oh.astype(in_dtype))

    # Fused output projection: one full-width matmul (K = d, N = d).
    o = jnp.concatenate(head_outs, axis=-1).reshape(rows, d)
    out = jnp.dot(o, wo_ref[...], preferred_element_type=jnp.float32)
    o_ref[...] = out.reshape(gb, g, d).astype(o_ref.dtype)


def _pick_group_block(n_g, g, target_rows=512):
    """Largest divisor of n_g with gb*g <= target_rows, keeping >=2 grid steps."""
    best = 1
    for gb in range(1, n_g + 1):
        if n_g % gb:
            continue
        if gb * g > target_rows:
            break
        if n_g // gb >= 2 or n_g == 1:
            best = gb
    return best


def _vmem_limit_bytes(gb, g, h, d, in_itemsize, w_itemsize):
    rows = gb * g
    act = 3 * gb * g * d * in_itemsize            # x, pe, out blocks
    dm = gb * h * g * g * 4                       # decay-mask block (f32)
    wts = 4 * d * d * w_itemsize                  # wq + wk + wv + wo
    work = 8 * rows * d * 4 + 4 * gb * g * g * 4  # f32 working set (q,k,v,...)
    need = 2 * (act + dm) + wts + work            # x2 for double buffering
    # Keep the (safe-everywhere) 32 MiB default unless bigger blocks need
    # more; never ask for more than v7x's 64 MiB physical VMEM.
    return int(min(max(32 * 2 ** 20, 2 * need), 64 * 2 ** 20))


def multi_scale_retention_softmax(x, pe, decay_mask, wq, wk, wv, wo, num_heads,
                                  *, group_block=None):
    n_g, g, d = x.shape
    h = num_heads
    hd = d // h
    scaling = float(hd) ** -0.5

    # Host-side weight prep: pre-transpose to (in, out) and fold the
    # 1/sqrt(key_dim) scaling into Wk.
    wq_t = wq.T                                   # (d, d)
    wk_t = (wk * scaling).T                       # (d, d)
    wv_t = wv.T                                   # (d, d)
    wo_t = wo.T                                   # (d, d)

    gb = group_block if group_block is not None else _pick_group_block(n_g, g)
    assert n_g % gb == 0, "group_block must divide n_groups"
    n_blocks = n_g // gb

    in_itemsize = jnp.dtype(x.dtype).itemsize
    w_itemsize = jnp.dtype(wq.dtype).itemsize
    vmem_limit = _vmem_limit_bytes(gb, g, h, d, in_itemsize, w_itemsize)

    kernel = functools.partial(_msr_kernel, num_heads=h, head_dim=hd)

    return pl.pallas_call(
        kernel,
        out_shape=jax.ShapeDtypeStruct((n_g, g, d), x.dtype),
        grid_spec=pltpu.PrefetchScalarGridSpec(
            num_scalar_prefetch=0,
            grid=(n_blocks,),
            in_specs=[
                pl.BlockSpec((gb, g, d), lambda i: (i, 0, 0)),        # x
                pl.BlockSpec((gb, g, d), lambda i: (i, 0, 0)),        # pe
                pl.BlockSpec((gb, h, g, g), lambda i: (i, 0, 0, 0)),  # decay
                pl.BlockSpec((d, d), lambda i: (0, 0)),               # Wq^T
                pl.BlockSpec((d, d), lambda i: (0, 0)),               # Wk^T*s
                pl.BlockSpec((d, d), lambda i: (0, 0)),               # Wv^T
                pl.BlockSpec((d, d), lambda i: (0, 0)),               # Wo^T
            ],
            out_specs=pl.BlockSpec((gb, g, d), lambda i: (i, 0, 0)),
        ),
        compiler_params=pltpu.CompilerParams(
            dimension_semantics=("parallel",),
            vmem_limit_bytes=vmem_limit,
        ),
    )(x, pe, decay_mask, wq_t, wk_t, wv_t, wo_t)


def _xavier_uniform(key, shape, gain):
    fan_out, fan_in = shape
    bound = gain * (6.0 / (fan_in + fan_out)) ** 0.5
    return jax.random.uniform(key, shape, jnp.float32, -bound, bound)


def _reference(x, pe, decay_mask, wq, wk, wv, wo, num_heads):
    # Pure-JAX reference mirroring the PyTorch forward.
    n_g, g, d = x.shape
    kd = d // num_heads
    scaling = float(kd) ** -0.5
    q = (x + pe) @ wq.T
    k = (x + pe) @ wk.T * scaling
    v = x @ wv.T
    q = q.reshape(n_g, g, num_heads, kd).transpose(0, 2, 1, 3)
    k = k.reshape(n_g, g, num_heads, kd).transpose(0, 2, 1, 3)
    v = v.reshape(n_g, g, num_heads, kd).transpose(0, 2, 1, 3)
    s = jnp.einsum("bhqc,bhkc->bhqk", q, k)
    p = jax.nn.softmax(s.astype(jnp.float32), axis=-1).astype(s.dtype)
    p = p * decay_mask
    o = jnp.einsum("bhqk,bhkc->bhqc", p, v)
    o = o.transpose(0, 2, 1, 3).reshape(n_g, g, d)
    return o @ wo.T


if __name__ == "__main__":
    embed_dim = 32
    num_heads = 4
    n_groups = 2
    group_size = 8

    key = jax.random.PRNGKey(0)
    kx, kpe, kdm, k1, k2, k3, k4 = jax.random.split(key, 7)

    x = jax.random.normal(kx, (n_groups, group_size, embed_dim), jnp.float32)
    pe = jax.random.normal(kpe, (n_groups, group_size, embed_dim), jnp.float32)
    decay_mask = jax.random.uniform(
        kdm, (n_groups, num_heads, group_size, group_size), jnp.float32,
        minval=0.1, maxval=1.0)

    gain = 2.0 ** -2.5
    wq = _xavier_uniform(k1, (embed_dim, embed_dim), gain)
    wk = _xavier_uniform(k2, (embed_dim, embed_dim), gain)
    wv = _xavier_uniform(k3, (embed_dim, embed_dim), gain)
    wo = _xavier_uniform(k4, (embed_dim, embed_dim), 1.0)

    out = multi_scale_retention_softmax(
        x, pe, decay_mask, wq, wk, wv, wo, num_heads)
    out = jax.block_until_ready(out)

    ref = _reference(x, pe, decay_mask, wq, wk, wv, wo, num_heads)
    assert out.shape == (n_groups, group_size, embed_dim)
    assert jnp.allclose(out, ref, atol=2e-5, rtol=2e-5), "mismatch vs reference"

    print("KERNEL_OK")
</pallas_src>

<mosaic_0001>
module attributes {stable_mosaic.version = 11 : i64} {
  func.func @_msr_kernel(%arg0: i32, %arg1: memref<1x8x32xf32, #tpu.memory_space<vmem>>, %arg2: memref<1x8x32xf32, #tpu.memory_space<vmem>>, %arg3: memref<1x4x8x8xf32, #tpu.memory_space<vmem>>, %arg4: memref<32x32xf32, #tpu.memory_space<vmem>>, %arg5: memref<32x32xf32, #tpu.memory_space<vmem>>, %arg6: memref<32x32xf32, #tpu.memory_space<vmem>>, %arg7: memref<32x32xf32, #tpu.memory_space<vmem>>, %arg8: memref<1x8x32xf32, #tpu.memory_space<vmem>>) attributes {dimension_semantics = [#tpu.dimension_semantics<parallel>], iteration_bounds = array<i64: 2>, scalar_prefetch = 0 : i64, scratch_operands = 0 : i64, tpu.core_type = #tpu.core_type<tc>, window_params = [{transform_indices = @transform_0, window_bounds = array<i64: 1, 8, 32>}, {transform_indices = @transform_1, window_bounds = array<i64: 1, 8, 32>}, {transform_indices = @transform_2, window_bounds = array<i64: 1, 4, 8, 8>}, {pipeline_mode = #tpu.pipeline_mode<synchronous>, transform_indices = @transform_3, window_bounds = array<i64: 32, 32>}, {pipeline_mode = #tpu.pipeline_mode<synchronous>, transform_indices = @transform_4, window_bounds = array<i64: 32, 32>}, {pipeline_mode = #tpu.pipeline_mode<synchronous>, transform_indices = @transform_5, window_bounds = array<i64: 32, 32>}, {pipeline_mode = #tpu.pipeline_mode<synchronous>, transform_indices = @transform_6, window_bounds = array<i64: 32, 32>}, {transform_indices = @transform_7, window_bounds = array<i64: 1, 8, 32>}]} {
    %c0 = arith.constant 0 : index
    %c0_0 = arith.constant 0 : index
    %c0_1 = arith.constant 0 : index
    %0 = vector.load %arg1[%c0, %c0_0, %c0_1] : memref<1x8x32xf32, #tpu.memory_space<vmem>>, vector<1x8x32xf32>
    %1 = vector.shape_cast %0 : vector<1x8x32xf32> to vector<8x32xf32>
    %c0_2 = arith.constant 0 : index
    %c0_3 = arith.constant 0 : index
    %c0_4 = arith.constant 0 : index
    %2 = vector.load %arg2[%c0_2, %c0_3, %c0_4] : memref<1x8x32xf32, #tpu.memory_space<vmem>>, vector<1x8x32xf32>
    %3 = vector.shape_cast %2 : vector<1x8x32xf32> to vector<8x32xf32>
    %4 = arith.addf %1, %3 : vector<8x32xf32>
    %c0_5 = arith.constant 0 : index
    %c0_6 = arith.constant 0 : index
    %5 = vector.load %arg4[%c0_5, %c0_6] : memref<32x32xf32, #tpu.memory_space<vmem>>, vector<32x32xf32>
    %cst = arith.constant dense<0.000000e+00> : vector<8x32xf32>
    %6 = tpu.matmul %4, %5, %cst {dimension_numbers = #tpu.dot_dimension_numbers<[1], [0], [0], [1], [0, 0, 1, 1], [], []>} : vector<8x32xf32>, vector<32x32xf32>, vector<8x32xf32> -> vector<8x32xf32>
    %c0_7 = arith.constant 0 : index
    %c0_8 = arith.constant 0 : index
    %7 = vector.load %arg5[%c0_7, %c0_8] : memref<32x32xf32, #tpu.memory_space<vmem>>, vector<32x32xf32>
    %cst_9 = arith.constant dense<0.000000e+00> : vector<8x32xf32>
    %8 = tpu.matmul %4, %7, %cst_9 {dimension_numbers = #tpu.dot_dimension_numbers<[1], [0], [0], [1], [0, 0, 1, 1], [], []>} : vector<8x32xf32>, vector<32x32xf32>, vector<8x32xf32> -> vector<8x32xf32>
    %c0_10 = arith.constant 0 : index
    %c0_11 = arith.constant 0 : index
    %9 = vector.load %arg6[%c0_10, %c0_11] : memref<32x32xf32, #tpu.memory_space<vmem>>, vector<32x32xf32>
    %cst_12 = arith.constant dense<0.000000e+00> : vector<8x32xf32>
    %10 = tpu.matmul %1, %9, %cst_12 {dimension_numbers = #tpu.dot_dimension_numbers<[1], [0], [0], [1], [0, 0, 1, 1], [], []>} : vector<8x32xf32>, vector<32x32xf32>, vector<8x32xf32> -> vector<8x32xf32>
    %c0_13 = arith.constant 0 : index
    %c0_14 = arith.constant 0 : index
    %c0_15 = arith.constant 0 : index
    %c0_16 = arith.constant 0 : index
    %11 = vector.load %arg3[%c0_13, %c0_14, %c0_15, %c0_16] : memref<1x4x8x8xf32, #tpu.memory_space<vmem>>, vector<1x4x8x8xf32>
    %12 = vector.extract_strided_slice %6 {offsets = [0, 0], sizes = [8, 8], strides = [1, 1]} : vector<8x32xf32> to vector<8x8xf32>
    %13 = vector.shape_cast %12 : vector<8x8xf32> to vector<1x8x8xf32>
    %14 = vector.extract_strided_slice %8 {offsets = [0, 0], sizes = [8, 8], strides = [1, 1]} : vector<8x32xf32> to vector<8x8xf32>
    %15 = vector.shape_cast %14 : vector<8x8xf32> to vector<1x8x8xf32>
    %16 = vector.extract_strided_slice %10 {offsets = [0, 0], sizes = [8, 8], strides = [1, 1]} : vector<8x32xf32> to vector<8x8xf32>
    %17 = vector.shape_cast %16 : vector<8x8xf32> to vector<1x8x8xf32>
    "tpu.trace_start"() <{level = 10 : i32, message = "bqc,bkc->bqk"}> : () -> ()
    %cst_17 = arith.constant dense<0.000000e+00> : vector<1x8x8xf32>
    %18 = tpu.matmul %13, %15, %cst_17 {dimension_numbers = #tpu.dot_dimension_numbers<[2], [2], [1], [1], [0, 0, 0, 1, 1, 1], [0], [0]>} : vector<1x8x8xf32>, vector<1x8x8xf32>, vector<1x8x8xf32> -> vector<1x8x8xf32>
    "tpu.trace_stop"() : () -> ()
    %cst_18 = arith.constant dense<0xFF800000> : vector<1x8xf32>
    %19 = vector.multi_reduction <maximumf>, %18, %cst_18 [2] : vector<1x8x8xf32> to vector<1x8xf32>
    %20 = vector.shape_cast %19 : vector<1x8xf32> to vector<1x8x1xf32>
    %21 = vector.broadcast %20 : vector<1x8x1xf32> to vector<1x8x8xf32>
    %22 = arith.subf %18, %21 : vector<1x8x8xf32>
    %23 = math.exp %22 : vector<1x8x8xf32>
    %cst_19 = arith.constant dense<0.000000e+00> : vector<1x8xf32>
    %24 = vector.multi_reduction <add>, %23, %cst_19 [2] : vector<1x8x8xf32> to vector<1x8xf32>
    %25 = vector.shape_cast %24 : vector<1x8xf32> to vector<1x8x1xf32>
    %26 = vector.extract_strided_slice %11 {offsets = [0, 0, 0, 0], sizes = [1, 1, 8, 8], strides = [1, 1, 1, 1]} : vector<1x4x8x8xf32> to vector<1x1x8x8xf32>
    %27 = vector.shape_cast %26 : vector<1x1x8x8xf32> to vector<1x8x8xf32>
    %28 = arith.mulf %23, %27 : vector<1x8x8xf32>
    "tpu.trace_start"() <{level = 10 : i32, message = "bqk,bkc->bqc"}> : () -> ()
    %cst_20 = arith.constant dense<0.000000e+00> : vector<1x8x8xf32>
    %29 = tpu.matmul %28, %17, %cst_20 {dimension_numbers = #tpu.dot_dimension_numbers<[2], [1], [1], [2], [0, 0, 0, 1, 1, 2], [0], [0]>} : vector<1x8x8xf32>, vector<1x8x8xf32>, vector<1x8x8xf32> -> vector<1x8x8xf32>
    "tpu.trace_stop"() : () -> ()
    %30 = tpu.reciprocal %25 : vector<1x8x1xf32> -> vector<1x8x1xf32>
    %31 = vector.broadcast %30 : vector<1x8x1xf32> to vector<1x8x8xf32>
    %32 = arith.mulf %29, %31 : vector<1x8x8xf32>
    %33 = vector.extract_strided_slice %6 {offsets = [0, 8], sizes = [8, 8], strides = [1, 1]} : vector<8x32xf32> to vector<8x8xf32>
    %34 = vector.shape_cast %33 : vector<8x8xf32> to vector<1x8x8xf32>
    %35 = vector.extract_strided_slice %8 {offsets = [0, 8], sizes = [8, 8], strides = [1, 1]} : vector<8x32xf32> to vector<8x8xf32>
    %36 = vector.shape_cast %35 : vector<8x8xf32> to vector<1x8x8xf32>
    %37 = vector.extract_strided_slice %10 {offsets = [0, 8], sizes = [8, 8], strides = [1, 1]} : vector<8x32xf32> to vector<8x8xf32>
    %38 = vector.shape_cast %37 : vector<8x8xf32> to vector<1x8x8xf32>
    "tpu.trace_start"() <{level = 10 : i32, message = "bqc,bkc->bqk"}> : () -> ()
    %cst_21 = arith.constant dense<0.000000e+00> : vector<1x8x8xf32>
    %39 = tpu.matmul %34, %36, %cst_21 {dimension_numbers = #tpu.dot_dimension_numbers<[2], [2], [1], [1], [0, 0, 0, 1, 1, 1], [0], [0]>} : vector<1x8x8xf32>, vector<1x8x8xf32>, vector<1x8x8xf32> -> vector<1x8x8xf32>
    "tpu.trace_stop"() : () -> ()
    %cst_22 = arith.constant dense<0xFF800000> : vector<1x8xf32>
    %40 = vector.multi_reduction <maximumf>, %39, %cst_22 [2] : vector<1x8x8xf32> to vector<1x8xf32>
    %41 = vector.shape_cast %40 : vector<1x8xf32> to vector<1x8x1xf32>
    %42 = vector.broadcast %41 : vector<1x8x1xf32> to vector<1x8x8xf32>
    %43 = arith.subf %39, %42 : vector<1x8x8xf32>
    %44 = math.exp %43 : vector<1x8x8xf32>
    %cst_23 = arith.constant dense<0.000000e+00> : vector<1x8xf32>
    %45 = vector.multi_reduction <add>, %44, %cst_23 [2] : vector<1x8x8xf32> to vector<1x8xf32>
    %46 = vector.shape_cast %45 : vector<1x8xf32> to vector<1x8x1xf32>
    %47 = vector.extract_strided_slice %11 {offsets = [0, 1, 0, 0], sizes = [1, 1, 8, 8], strides = [1, 1, 1, 1]} : vector<1x4x8x8xf32> to vector<1x1x8x8xf32>
    %48 = vector.shape_cast %47 : vector<1x1x8x8xf32> to vector<1x8x8xf32>
    %49 = arith.mulf %44, %48 : vector<1x8x8xf32>
    "tpu.trace_start"() <{level = 10 : i32, message = "bqk,bkc->bqc"}> : () -> ()
    %cst_24 = arith.constant dense<0.000000e+00> : vector<1x8x8xf32>
    %50 = tpu.matmul %49, %38, %cst_24 {dimension_numbers = #tpu.dot_dimension_numbers<[2], [1], [1], [2], [0, 0, 0, 1, 1, 2], [0], [0]>} : vector<1x8x8xf32>, vector<1x8x8xf32>, vector<1x8x8xf32> -> vector<1x8x8xf32>
    "tpu.trace_stop"() : () -> ()
    %51 = tpu.reciprocal %46 : vector<1x8x1xf32> -> vector<1x8x1xf32>
    %52 = vector.broadcast %51 : vector<1x8x1xf32> to vector<1x8x8xf32>
    %53 = arith.mulf %50, %52 : vector<1x8x8xf32>
    %54 = vector.extract_strided_slice %6 {offsets = [0, 16], sizes = [8, 8], strides = [1, 1]} : vector<8x32xf32> to vector<8x8xf32>
    %55 = vector.shape_cast %54 : vector<8x8xf32> to vector<1x8x8xf32>
    %56 = vector.extract_strided_slice %8 {offsets = [0, 16], sizes = [8, 8], strides = [1, 1]} : vector<8x32xf32> to vector<8x8xf32>
    %57 = vector.shape_cast %56 : vector<8x8xf32> to vector<1x8x8xf32>
    %58 = vector.extract_strided_slice %10 {offsets = [0, 16], sizes = [8, 8], strides = [1, 1]} : vector<8x32xf32> to vector<8x8xf32>
    %59 = vector.shape_cast %58 : vector<8x8xf32> to vector<1x8x8xf32>
    "tpu.trace_start"() <{level = 10 : i32, message = "bqc,bkc->bqk"}> : () -> ()
    %cst_25 = arith.constant dense<0.000000e+00> : vector<1x8x8xf32>
    %60 = tpu.matmul %55, %57, %cst_25 {dimension_numbers = #tpu.dot_dimension_numbers<[2], [2], [1], [1], [0, 0, 0, 1, 1, 1], [0], [0]>} : vector<1x8x8xf32>, vector<1x8x8xf32>, vector<1x8x8xf32> -> vector<1x8x8xf32>
    "tpu.trace_stop"() : () -> ()
    %cst_26 = arith.constant dense<0xFF800000> : vector<1x8xf32>
    %61 = vector.multi_reduction <maximumf>, %60, %cst_26 [2] : vector<1x8x8xf32> to vector<1x8xf32>
    %62 = vector.shape_cast %61 : vector<1x8xf32> to vector<1x8x1xf32>
    %63 = vector.broadcast %62 : vector<1x8x1xf32> to vector<1x8x8xf32>
    %64 = arith.subf %60, %63 : vector<1x8x8xf32>
    %65 = math.exp %64 : vector<1x8x8xf32>
    %cst_27 = arith.constant dense<0.000000e+00> : vector<1x8xf32>
    %66 = vector.multi_reduction <add>, %65, %cst_27 [2] : vector<1x8x8xf32> to vector<1x8xf32>
    %67 = vector.shape_cast %66 : vector<1x8xf32> to vector<1x8x1xf32>
    %68 = vector.extract_strided_slice %11 {offsets = [0, 2, 0, 0], sizes = [1, 1, 8, 8], strides = [1, 1, 1, 1]} : vector<1x4x8x8xf32> to vector<1x1x8x8xf32>
    %69 = vector.shape_cast %68 : vector<1x1x8x8xf32> to vector<1x8x8xf32>
    %70 = arith.mulf %65, %69 : vector<1x8x8xf32>
    "tpu.trace_start"() <{level = 10 : i32, message = "bqk,bkc->bqc"}> : () -> ()
    %cst_28 = arith.constant dense<0.000000e+00> : vector<1x8x8xf32>
    %71 = tpu.matmul %70, %59, %cst_28 {dimension_numbers = #tpu.dot_dimension_numbers<[2], [1], [1], [2], [0, 0, 0, 1, 1, 2], [0], [0]>} : vector<1x8x8xf32>, vector<1x8x8xf32>, vector<1x8x8xf32> -> vector<1x8x8xf32>
    "tpu.trace_stop"() : () -> ()
    %72 = tpu.reciprocal %67 : vector<1x8x1xf32> -> vector<1x8x1xf32>
    %73 = vector.broadcast %72 : vector<1x8x1xf32> to vector<1x8x8xf32>
    %74 = arith.mulf %71, %73 : vector<1x8x8xf32>
    %75 = vector.extract_strided_slice %6 {offsets = [0, 24], sizes = [8, 8], strides = [1, 1]} : vector<8x32xf32> to vector<8x8xf32>
    %76 = vector.shape_cast %75 : vector<8x8xf32> to vector<1x8x8xf32>
    %77 = vector.extract_strided_slice %8 {offsets = [0, 24], sizes = [8, 8], strides = [1, 1]} : vector<8x32xf32> to vector<8x8xf32>
    %78 = vector.shape_cast %77 : vector<8x8xf32> to vector<1x8x8xf32>
    %79 = vector.extract_strided_slice %10 {offsets = [0, 24], sizes = [8, 8], strides = [1, 1]} : vector<8x32xf32> to vector<8x8xf32>
    %80 = vector.shape_cast %79 : vector<8x8xf32> to vector<1x8x8xf32>
    "tpu.trace_start"() <{level = 10 : i32, message = "bqc,bkc->bqk"}> : () -> ()
    %cst_29 = arith.constant dense<0.000000e+00> : vector<1x8x8xf32>
    %81 = tpu.matmul %76, %78, %cst_29 {dimension_numbers = #tpu.dot_dimension_numbers<[2], [2], [1], [1], [0, 0, 0, 1, 1, 1], [0], [0]>} : vector<1x8x8xf32>, vector<1x8x8xf32>, vector<1x8x8xf32> -> vector<1x8x8xf32>
    "tpu.trace_stop"() : () -> ()
    %cst_30 = arith.constant dense<0xFF800000> : vector<1x8xf32>
    %82 = vector.multi_reduction <maximumf>, %81, %cst_30 [2] : vector<1x8x8xf32> to vector<1x8xf32>
    %83 = vector.shape_cast %82 : vector<1x8xf32> to vector<1x8x1xf32>
    %84 = vector.broadcast %83 : vector<1x8x1xf32> to vector<1x8x8xf32>
    %85 = arith.subf %81, %84 : vector<1x8x8xf32>
    %86 = math.exp %85 : vector<1x8x8xf32>
    %cst_31 = arith.constant dense<0.000000e+00> : vector<1x8xf32>
    %87 = vector.multi_reduction <add>, %86, %cst_31 [2] : vector<1x8x8xf32> to vector<1x8xf32>
    %88 = vector.shape_cast %87 : vector<1x8xf32> to vector<1x8x1xf32>
    %89 = vector.extract_strided_slice %11 {offsets = [0, 3, 0, 0], sizes = [1, 1, 8, 8], strides = [1, 1, 1, 1]} : vector<1x4x8x8xf32> to vector<1x1x8x8xf32>
    %90 = vector.shape_cast %89 : vector<1x1x8x8xf32> to vector<1x8x8xf32>
    %91 = arith.mulf %86, %90 : vector<1x8x8xf32>
    "tpu.trace_start"() <{level = 10 : i32, message = "bqk,bkc->bqc"}> : () -> ()
    %cst_32 = arith.constant dense<0.000000e+00> : vector<1x8x8xf32>
    %92 = tpu.matmul %91, %80, %cst_32 {dimension_numbers = #tpu.dot_dimension_numbers<[2], [1], [1], [2], [0, 0, 0, 1, 1, 2], [0], [0]>} : vector<1x8x8xf32>, vector<1x8x8xf32>, vector<1x8x8xf32> -> vector<1x8x8xf32>
    "tpu.trace_stop"() : () -> ()
    %93 = tpu.reciprocal %88 : vector<1x8x1xf32> -> vector<1x8x1xf32>
    %94 = vector.broadcast %93 : vector<1x8x1xf32> to vector<1x8x8xf32>
    %95 = arith.mulf %92, %94 : vector<1x8x8xf32>
    %96 = tpu.concatenate %32, %53, %74, %95 in 2 : vector<1x8x8xf32>, vector<1x8x8xf32>, vector<1x8x8xf32>, vector<1x8x8xf32> -> vector<1x8x32xf32>
    %97 = vector.shape_cast %96 : vector<1x8x32xf32> to vector<8x32xf32>
    %c0_33 = arith.constant 0 : index
    %c0_34 = arith.constant 0 : index
    %98 = vector.load %arg7[%c0_33, %c0_34] : memref<32x32xf32, #tpu.memory_space<vmem>>, vector<32x32xf32>
    %cst_35 = arith.constant dense<0.000000e+00> : vector<8x32xf32>
    %99 = tpu.matmul %97, %98, %cst_35 {dimension_numbers = #tpu.dot_dimension_numbers<[1], [0], [0], [1], [0, 0, 1, 1], [], []>} : vector<8x32xf32>, vector<32x32xf32>, vector<8x32xf32> -> vector<8x32xf32>
    %100 = vector.shape_cast %99 : vector<8x32xf32> to vector<1x8x32xf32>
    %c0_36 = arith.constant 0 : index
    %c0_37 = arith.constant 0 : index
    %c0_38 = arith.constant 0 : index
    %101 = vector.load %arg8[%c0_36, %c0_37, %c0_38] : memref<1x8x32xf32, #tpu.memory_space<vmem>>, vector<1x8x32xf32>
    tpu.vector_store %arg8[%c0_36, %c0_37, %c0_38], %100 {strides = array<i32>} : memref<1x8x32xf32, #tpu.memory_space<vmem>>, vector<1x8x32xf32>,
    return
  }
  func.func @transform_0(%arg0: i32) -> (i32, i32, i32) {
    %c0_i32 = arith.constant 0 : i32
    %c0_i32_0 = arith.constant 0 : i32
    %c0_i32_1 = arith.constant 0 : i32
    return %arg0, %c0_i32, %c0_i32_0 : i32, i32, i32
  }
  func.func @transform_1(%arg0: i32) -> (i32, i32, i32) {
    %c0_i32 = arith.constant 0 : i32
    %c0_i32_0 = arith.constant 0 : i32
    %c0_i32_1 = arith.constant 0 : i32
    return %arg0, %c0_i32, %c0_i32_0 : i32, i32, i32
  }
  func.func @transform_2(%arg0: i32) -> (i32, i32, i32, i32) {
    %c0_i32 = arith.constant 0 : i32
    %c0_i32_0 = arith.constant 0 : i32
    %c0_i32_1 = arith.constant 0 : i32
    %c0_i32_2 = arith.constant 0 : i32
    return %arg0, %c0_i32, %c0_i32_0, %c0_i32_1 : i32, i32, i32, i32
  }
  func.func @transform_3(%arg0: i32) -> (i32, i32) {
    %c0_i32 = arith.constant 0 : i32
    %c0_i32_0 = arith.constant 0 : i32
    %c0_i32_1 = arith.constant 0 : i32
    return %c0_i32, %c0_i32_0 : i32, i32
  }
  func.func @transform_4(%arg0: i32) -> (i32, i32) {
    %c0_i32 = arith.constant 0 : i32
    %c0_i32_0 = arith.constant 0 : i32
    %c0_i32_1 = arith.constant 0 : i32
    return %c0_i32, %c0_i32_0 : i32, i32
  }
  func.func @transform_5(%arg0: i32) -> (i32, i32) {
    %c0_i32 = arith.constant 0 : i32
    %c0_i32_0 = arith.constant 0 : i32
    %c0_i32_1 = arith.constant 0 : i32
    return %c0_i32, %c0_i32_0 : i32, i32
  }
  func.func @transform_6(%arg0: i32) -> (i32, i32) {
    %c0_i32 = arith.constant 0 : i32
    %c0_i32_0 = arith.constant 0 : i32
    %c0_i32_1 = arith.constant 0 : i32
    return %c0_i32, %c0_i32_0 : i32, i32
  }
  func.func @transform_7(%arg0: i32) -> (i32, i32, i32) {
    %c0_i32 = arith.constant 0 : i32
    %c0_i32_0 = arith.constant 0 : i32
    %c0_i32_1 = arith.constant 0 : i32
    return %arg0, %c0_i32, %c0_i32_0 : i32, i32, i32
  }
}

</mosaic_0001>

<bundles_post_ra>
// kernel: tpu_custom_call.1
= control target key start
LH: loop header
LB: loop body
LE: loop exit
PB: predicated region body
PF: predicated region fallthrough
CT: control target
= control target key end

     0   :  { %s1841_s0 = inlined_call_operand.hbm [shape: f32[2,8,32], index: 0, kind: input, shape index: {}]   ;;  %s1842_s1 = inlined_call_operand.hbm [shape: f32[2,8,32], index: 1, kind: input, shape index: {}]   ;;  %s1843_s2 = inlined_call_operand.hbm [shape: f32[2,4,8,8], index: 2, kind: input, shape index: {}]   ;;  %s1844_s3 = inlined_call_operand.hbm [shape: f32[32,32], index: 3, kind: input, shape index: {}]   ;;  %s1845_s4 = inlined_call_operand.hbm [shape: f32[32,32], index: 4, kind: input, shape index: {}]   ;;  %s1846_s5 = inlined_call_operand.hbm [shape: f32[32,32], index: 5, kind: input, shape index: {}]   ;;  %s1847_s6 = inlined_call_operand.hbm [shape: f32[32,32], index: 6, kind: input, shape index: {}]   ;;  %s1848_s7 = inlined_call_operand.hbm [shape: f32[2,8,32], index: 7, kind: output, shape index: {}]  }
   0x1   :  { %1859 = sst [smem:[#allocation23_spill]] %s1842_s1 }
   0x2   :  { %1860 = sst [smem:[#allocation24_spill]] %s1844_s3 }
   0x3   :  { %1861 = sst [smem:[#allocation25_spill]] %s1845_s4 }
   0x4   :  { %1862 = sst [smem:[#allocation26_spill]] %s1846_s5 }
   0x5   :  { %1863 = sst [smem:[#allocation27_spill]] %s1847_s6 }
   0x6   :  { %12 = vsyncpa [#allocation3], 0 }
   0x7   :  { %14 = vsyncpa [#allocation3 + $0x1], 0 }
   0x8   :  { %15 = vsyncpa [#allocation6], 0 }
   0x9   :  { %17 = vsyncpa [#allocation6 + $0x1], 0 }
   0xa   :  { %18 = vsyncpa [#allocation9], 0 }
   0xb   :  { %19 = vsyncpa [#allocation12], 0 }
   0xc   :  { %20 = vsyncpa [#allocation4], 0 }
   0xd   :  { %22 = vsyncpa [#allocation4 + $0x1], 0  ;;  %s1558_s24 = smov 0   ;;  %s1560_s25 = smov 0  }
   0xe   :  { %s1562_s26 = smov 0   ;;  %s1564_s27 = smov 0  }
   0xf LB: > { %1864 = sst [smem:[#allocation20_spill]] %s1500_s26  ;;  %s1582_s8 = sadd.s32 4294967295, %s1504_s27   ;;  %s1504_s27 = sphi %s1564_s27, %s1888_s27   ;;  %s1500_s26 = sphi %s1562_s26, %s1890_s26   ;;  %s1496_s25 = sphi %s1560_s25, %s1892_s25   ;;  %s1492_s24 = sphi %s1558_s24, %s1891_s24  }
  0x10   : > { %s1865_s3 = sld [smem:[#allocation24_spill]]  ;;  %p1052_p0 = scmp.ge.s32.totalorder %s1504_s27, 1 }
  0x11   : > { %p1854_p1 = scmp.eq.s32.totalorder %s1582_s8, 0  ;;  %p221_p2 = scmp.lt.s32.totalorder %s1504_s27, 3 }
  0x12   : > { %s1506_s10 = smov [#allocation8]   ;;  %s1867_s5 = sld [smem:[#allocation26_spill]] }
  0x13   : > { %p1587_p3 = pnand %p1052_p0, %p221_p2  ;;  %s234_s11 = sshll.u32 %s1506_s10, 4  ;;  %s235_s11 = int_to_ptr.vmem [resolvable:$true] %s234_s11 }
  0x14   : > { %s1507_s16 = smov [#allocation11]   ;;  %s1849_s18 = smov 128  }
  0x15   : > { %p1119_p4 = pneg %p1587_p3  ;;  %s262_s17 = sshll.u32 %s1507_s16, 4  ;;  %s263_s17 = int_to_ptr.vmem [resolvable:$true] %s262_s17 }
  0x16   : > { %s232_s30 = sshll.u32 %s1865_s3, 4  ;;  %s1851_s19 = smov 8   ;;  %s233_s30 = int_to_ptr.hbm [resolvable:$true] %s232_s30 }
  0x17   : > { %p1599_p6 = pnand %p1119_p4, %p1854_p1  ;;  %s1051_s20 = sadd.s32 4294967294, %s1504_s27  }
  0x18   : > { %s260_s14 = sshll.u32 %s1867_s5, 4  ;;  %s1615_s21 = sadd.s32 1, %s1504_s27   ;;  %s261_s14 = int_to_ptr.hbm [resolvable:$true] %s260_s14 }
  0x19   : > { %1122 = dma.hbm_to_vmem [thread:$0]  (!%p1599_p6), %s233_s30, 512, %s235_s11, [#allocation9], %s1849_s18, %s1849_s18, %s1851_s19  }
  0x1a   : > { %1128 = dma.hbm_to_vmem [thread:$0]  (!%p1599_p6), %s261_s14, 512, %s263_s17, [#allocation12], %s1849_s18, %s1849_s18, %s1851_s19  }
  0x1b   : > { %1869 = sst [smem:[#allocation21_spill]] %s1615_s21  ;;  %s32_s22 = ssub.s32 %s1504_s27, %s1615_s21 }
  0x1c   : > { %s35_s23 = sadd.s32 1, %s1500_s26  ;;  %p33_p7 = scmp.eq.s32.totalorder %s32_s22, 0 }
  0x1d   : > { %p42_p8 = scmp.ne.s32.totalorder %s1500_s26, %s1496_s25  ;;  %p43_p9 = scmp.eq.s32.totalorder %s1504_s27, 0 }
  0x1e   : > { %p48_p10 = scmp.ne.s32.totalorder %s1496_s25, %s1492_s24  ;;  %p208_p13 = scmp.eq.s32.totalorder %s1582_s8, 1 }
  0x1f   : > { %s1626_s28 = scalar_select %p33_p7, %s1500_s26, %s35_s23  }
  0x20   : > { %p44_p11 = por %p43_p9, %p42_p8  ;;  %p1630_p12 = por %p1854_p1, %p48_p10 }
  0x21   : > { %1870 = sst [smem:[#allocation22_spill]] %s1626_s28  ;;  %p214_p0 = scmp.eq.s32.totalorder %s1051_s20, 1 }
  0x22   : > { %p1150_p2 = scmp.lt.s32.totalorder %s1504_s27, 2  ;;  %s1637_s30 = sand.u32 1, %s1500_s26  }
  0x23   : > { %p1639_p4 = por %p208_p13, %p42_p8  ;;  %p1643_p5 = por %p214_p0, %p48_p10 }
  0x24   : > { %s1853_s12 = sshll.u32 %s1637_s30, 3  ;;  %s1855_s13 = sshll.u32 %s1504_s27, 3 }
  0x25   : > { %p1649_p7 = pnand %p1150_p2, %p44_p11  ;;  %s309_s16 = sand.u32 1, %s1504_s27  }
  0x26   : > { %s1875_s1 = sld [smem:[#allocation23_spill]]  ;;  %s313_s18 = scalar_lea.vmem [#allocation5], %s1853_s12 }
  0x27   : > { %s321_s19 = sshll.u32 %s313_s18, 4  ;;  %s1661_s3 = scalar_lea.sflag [#allocation6], %s309_s16  ;;  %s322_s19 = int_to_ptr.vmem [resolvable:$true] %s321_s19 }
  0x28   : > { %p1280_p9 = pneg %p1649_p7 }
  0x2c   : > { %s317_s22 = scalar_lea.hbm %s1875_s1, %s1855_s13 }
  0x2d   : > { %s319_s23 = sshll.u32 %s317_s22, 4  ;;  %s1283_s22 = scalar_lea.hbm %s1875_s1, 16  ;;  %s320_s23 = int_to_ptr.hbm [resolvable:$true] %s319_s23 }
  0x2e   : > { %s1276_s5 = sshra.s32 %s320_s23, 4  ;;  %s1277_s5 = int_to_ptr.hbm [resolvable:$true] %s1276_s5 }
  0x2f   : > { %s1278_s28 = scalar_lea.hbm %s1277_s5, 8  ;;  %p1284_p13 = scmp.lt.s32.totalorder %s1277_s5, %s1875_s1 }
  0x30   : > { %p1279_p8 = scmp.ne.s32.totalorder %s1277_s5, %s1278_s28  ;;  %p1285_p0 = scmp.lt.s32.totalorder %s1283_s22, %s1278_s28 }
  0x32   : > { %p1281_p10 = pnand %p1280_p9, %p1279_p8  ;;  %p1286_p2 = por %p1285_p0, %p1284_p13 }
  0x34   : > { %p1282_p11 = pneg %p1281_p10 }
  0x36   : > { %p1287_p1 = pnand %p1286_p2, %p1282_p11 }
  0x38   : > { %1290 = shalt.err (!%p1287_p1)
}
  0x39   : > { %1138 = dma.hbm_to_vmem [thread:$0]  (!%p1649_p7), %s320_s23, 128, %s322_s19, %s1661_s3  }
  0x3a   : > { %s1062_s16 = sshll.u32 %s1637_s30, 5  ;;  %s1876_s4 = sld [smem:[#allocation25_spill]] }
  0x3b   : > { %s1681_s5 = scalar_lea.vmem [#allocation7], %s1062_s16  ;;  %s1510_s12 = smov [#allocation10]  }
  0x3c   : > { %s248_s22 = sshll.u32 %s1510_s12, 4  ;;  %s1877_s6 = sld [smem:[#allocation27_spill]]  ;;  %s249_s22 = int_to_ptr.vmem [resolvable:$true] %s248_s22 }
  0x3d   : > { %s1878_s23 = smov 8   ;;  %s1879_s26 = smov 128  }
  0x3e   : > { %s1511_s13 = smov [#allocation13]   ;;  %s1880_s17 = sshll.u32 %s1504_s27, 3 }
  0x3f   : > { %s276_s16 = sshll.u32 %s1511_s13, 4  ;;  %s298_s1 = scalar_lea.hbm %s1841_s0, %s1880_s17  ;;  %s277_s16 = int_to_ptr.vmem [resolvable:$true] %s276_s16 }
  0x40   : > { %s246_s20 = sshll.u32 %s1876_s4, 4  ;;  %s1881_s18 = sshll.u32 %s1637_s30, 3  ;;  %s247_s20 = int_to_ptr.hbm [resolvable:$true] %s246_s20 }
  0x41   : > { %1125 = dma.hbm_to_vmem [thread:$0]  (!%p1599_p6), %s247_s20, 512, %s249_s22, [#allocation9], %s1879_s26, %s1879_s26, %s1878_s23  }
  0x42   : > { %s274_s19 = sshll.u32 %s1877_s6, 4  ;;  %s294_s4 = scalar_lea.vmem [#allocation2], %s1881_s18  ;;  %s275_s19 = int_to_ptr.hbm [resolvable:$true] %s274_s19 }
  0x43   : > { %1131 = dma.hbm_to_vmem [thread:$0]  (!%p1599_p6), %s275_s19, 512, %s277_s16, [#allocation12], %s1879_s26, %s1879_s26, %s1878_s23  }
  0x44   : > { %s302_s6 = sshll.u32 %s294_s4, 4  ;;  %s300_s21 = sshll.u32 %s298_s1, 4  ;;  %s303_s6 = int_to_ptr.vmem [resolvable:$true] %s302_s6  ;;  %s301_s21 = int_to_ptr.hbm [resolvable:$true] %s300_s21 }
  0x45   : > { %s1094_s20 = sshll.u32 %s1504_s27, 5  ;;  %s291_s22 = scalar_lea.sflag [#allocation3], %s1637_s30 }
  0x46   : > { %s1366_s13 = sshra.s32 %s301_s21, 4  ;;  %s1373_s28 = scalar_lea.hbm %s1841_s0, 16  ;;  %s1367_s13 = int_to_ptr.hbm [resolvable:$true] %s1366_s13 }
  0x47   : > { %s1368_s15 = scalar_lea.hbm %s1367_s13, 8  ;;  %p1374_p10 = scmp.lt.s32.totalorder %s1367_s13, %s1841_s0 }
  0x48   : > { %p1369_p1 = scmp.ne.s32.totalorder %s1367_s13, %s1368_s15  ;;  %p1375_p11 = scmp.lt.s32.totalorder %s1373_s28, %s1368_s15 }
  0x4a   : > { %p1371_p6 = pnand %p1369_p1, %p1280_p9  ;;  %p1376_p13 = por %p1375_p11, %p1374_p10 }
  0x4c   : > { %p1372_p8 = pneg %p1371_p6 }
  0x4e   : > { %p1377_p0 = pnand %p1376_p13, %p1372_p8 }
  0x50   : > { %1380 = shalt.err (!%p1377_p0)
}
  0x51   : > { %1135 = dma.hbm_to_vmem [thread:$0]  (!%p1649_p7), %s301_s21, 128, %s303_s6, %s291_s22  }
  0x52   : > { %s1882_s4 = sshll.u32 %s1681_s5, 4  ;;  %s337_s18 = scalar_lea.hbm %s1843_s2, %s1094_s20  ;;  %s341_s4 = int_to_ptr.vmem [resolvable:$true] %s1882_s4 }
  0x53   : > { %s338_s19 = sshll.u32 %s337_s18, 4  ;;  %s1403_s6 = scalar_lea.hbm %s1843_s2, 64  ;;  %s339_s19 = int_to_ptr.hbm [resolvable:$true] %s338_s19 }
  0x54   : > { %s1396_s16 = sshra.s32 %s339_s19, 4  ;;  %s1397_s16 = int_to_ptr.hbm [resolvable:$true] %s1396_s16 }
  0x55   : > { %s1398_s13 = scalar_lea.hbm %s1397_s16, 32  ;;  %p1404_p8 = scmp.lt.s32.totalorder %s1397_s16, %s1843_s2 }
  0x56   : > { %p1399_p2 = scmp.ne.s32.totalorder %s1397_s16, %s1398_s13  ;;  %p1405_p10 = scmp.lt.s32.totalorder %s1403_s6, %s1398_s13 }
  0x58   : > { %p1401_p1 = pnand %p1399_p2, %p1280_p9  ;;  %p1406_p11 = por %p1405_p10, %p1404_p8 }
  0x5a   : > { %p1402_p6 = pneg %p1401_p1 }
  0x5c   : > { %p1407_p13 = pnand %p1406_p11, %p1402_p6 }
  0x5e   : > { %1410 = shalt.err (!%p1407_p13)
}
  0x5f   : > { %1141 = dma.hbm_to_vmem [thread:$0]  (!%p1649_p7), %s339_s19, 512, %s341_s4, %s1661_s3, %s1879_s26, %s1879_s26, %s1878_s23  }
  0x60   : > { %352 = sbr.rel (%p1587_p3) target bundleno = 1022 (0x3fe), region = 48  ;;  %s1740_s20 = sand.u32 (!%p1587_p3), 1, %s1496_s25  }
  0x61   : > { %s1743_s22 = sshll.u32 (!%p1587_p3), %s1740_s20, 3  ;;  %s355_s17 = scalar_lea.sflag (!%p1587_p3), [#allocation3], %s1740_s20 }
  0x62   : > { %s358_s12 = scalar_lea.vmem (!%p1587_p3), [#allocation2], %s1743_s22 }
  0x65   : > { %1471 = dma.done.wait (%p1630_p12), %s355_s17, 128  }
  0x66   : > { %1473 = vsyncadd (%p1630_p12), %s355_s17, 4294967168  ;;  %s364_s3 = sand.u32 1, %s1582_s8   ;;  %s368_s9 = scalar_lea.vmem [#allocation5], %s1743_s22 }
  0x67   : > { %s365_s26 = scalar_lea.sflag [#allocation6], %s364_s3 }
  0x68   : > { %1475 = dma.done.wait (%p1630_p12), %s365_s26, 640  }
  0x69   : > { %1477 = vsyncadd (%p1630_p12), %s365_s26, 4294966656  ;;  %s1068_s14 = sshll.u32 %s1740_s20, 5  ;;  %p1883_p3 = scmp.eq.s32.totalorder %s1582_s8, 0 }
  0x6a   : > { %s1758_s23 = scalar_lea.vmem [#allocation7], %s1068_s14 }
  0x6b   : > { %1479 = dma.done.wait (%p1883_p3), [#allocation9], 1024   ;;  %p1884_p7 = pmov %p1883_p3 }
  0x6c   : > { %p1885_p9 = pmov %p1883_p3 }
  0x6d   : > { %1481 = vsyncadd (%p1884_p7), [#allocation9], 4294966272 }
  0x6e   : > { %1483 = dma.done.wait (%p1885_p9), [#allocation12], 1024   ;;  %p1886_p0 = pmov %p1883_p3 }
  0x6f   : > { %v474_v0 = vld [vmem:[#allocation10 + $0x18] sm:$0xff]  ;;  %v473_v1 = vld [vmem:[#allocation10 + $0x10] sm:$0xff]  ;;  %v472_v3 = vld [vmem:[#allocation10 + $0x8] sm:$0xff]  ;;  %vm447_vm0 = vcmask 261120   ;;  %vm526_vm1 = vcmask 64512   ;;  %s1512_s29 = smov 104  }
  0x70   : > { %1485 = vsyncadd (%p1886_p0), [#allocation12], 4294966272  ;;  %v446_v2 = vld [vmem:[#allocation8 + $0x18] sm:$0xff]  ;;  %487 = vmatpush.msra.mxu1 %v474_v0  ;;  %v445_v4 = vld [vmem:[#allocation8 + $0x10] sm:$0xff]  ;;  %s1513_s4 = smov 120   ;;  %s1514_s30 = smov 112  }
  0x71   : > { %463 = vmatpush.msra.mxu0 %v446_v2  ;;  %v444_v5 = vld [vmem:[#allocation8 + $0x8] sm:$0xff]  ;;  %v441_v7 = vld [vmem:[%s368_s9] sm:$0xff]  ;;  %v471_v8 = vld [vmem:[#allocation10] sm:$0xff]  ;;  %s1515_s1 = smov 8   ;;  %s1516_s18 = smov 16  }
  0x72   : > { %v440_v6 = vld [vmem:[%s358_s12] sm:$0xff]  ;;  %488 = vmatpush.msra.mxu1 %v473_v1  ;;  %v498_v13 = vld [vmem:[#allocation11 + $0x18] sm:$0xff]  ;;  %v497_v14 = vld [vmem:[#allocation11 + $0x10] sm:$0xff]  ;;  %s1517_s19 = smov 24   ;;  %s1091_s16 = sshll.u32 %s1582_s8, 3 }
  0x73   : > { %464 = vmatpush.msra.mxu0 %v445_v4  ;;  %v442_v9 = vadd.f32 %v441_v7, %v440_v6  ;;  %v443_v10 = vld [vmem:[#allocation8] sm:$0xff]  ;;  %514 = vmatpush.msra.mxu2 %v498_v13  ;;  %v496_v15 = vld [vmem:[#allocation11 + $0x8] sm:$0xff]  ;;  %v524_v55 = vld [vmem:[%s1758_s23 + $0x10] sm:$0xff]  ;;  %s895_s28 = scalar_lea.hbm %s1848_s7, %s1091_s16  ;;  %s439_s6 = scalar_lea.vmem [#allocation14], %s1743_s22 }
  0x74   : > { %489 = vmatpush.msra.mxu1 %v472_v3  ;;  %v495_v16 = vld [vmem:[#allocation11] sm:$0xff]  ;;  %v523_v44 = vld [vmem:[%s1758_s23 + $0x8] sm:$0xff]  ;;  %v525_v58 = vld [vmem:[%s1758_s23 + $0x18] sm:$0xff]  ;;  %s897_s21 = sshll.u32 %s439_s6, 4  ;;  %s899_s5 = sshll.u32 %s895_s28, 4  ;;  %s898_s21 = int_to_ptr.vmem [resolvable:$true] %s897_s21  ;;  %s900_s5 = int_to_ptr.hbm [resolvable:$true] %s899_s5 }
  0x75   : > { %465 = vmatpush.msra.mxu0 %v444_v5  ;;  %515 = vmatpush.msra.mxu2 %v497_v14  ;;  %v522_v34 = vld [vmem:[%s1758_s23] sm:$0xff]  ;;  %s885_s17 = scalar_lea.sflag [#allocation4], %s1740_s20  ;;  %s1440_s12 = sshra.s32 %s900_s5, 4  ;;  %s1441_s12 = int_to_ptr.hbm [resolvable:$true] %s1440_s12 }
  0x76   : > { %490 = vmatpush.msra.mxu1 %v471_v8  ;;  %s1442_s3 = scalar_lea.hbm %s1441_s12, 8  ;;  %s1446_s9 = scalar_lea.hbm %s1848_s7, 16 }
  0x77   : > { %466 = vmatpush.msra.mxu0 %v443_v10  ;;  %1075 = vmatmul.msk.f32.vlgmr.msra.gmra.mxu1 %vm447_vm0, %v442_v9  ;;  %p1443_p12 = scmp.ne.s32.totalorder %s1441_s12, %s1442_s3  ;;  %p1447_p6 = scmp.lt.s32.totalorder %s1441_s12, %s1848_s7 }
  0x78   : > { %1074 = vmatmul.msk.f32.vlgmr.msra.gmra.mxu0 %vm447_vm0, %v442_v9  ;;  %516 = vmatpush.msra.mxu2 %v496_v15  ;;  %p1448_p8 = scmp.lt.s32.totalorder %s1446_s9, %s1442_s3 }
  0x79   : > { %p1444_p2 = pnand %p1443_p12, %p1639_p4 }
  0x7a   : > { %517 = vmatpush.msra.mxu2 %v495_v16  ;;  %p1449_p10 = por %p1448_p8, %p1447_p6 }
  0x7b   : > { %1076 = vmatmul.msk.f32.vlgmr.msra.gmra.mxu2 %vm447_vm0, %v440_v6  ;;  %p1445_p1 = pneg %p1444_p2 }
  0x7d   : > { %p1450_p11 = pnand %p1449_p10, %p1445_p1 }
  0xf4   : > { %v492_v11 = vpop.f32.mrf.mxu1 }
  0xf5   : > { %762 = vrot.lane.b32.xlu2 %v492_v11, %s1512_s29  ;;  %603 = vrot.lane.b32.xlu1 %v492_v11, %s1513_s4  ;;  %v468_v12 = vpop.f32.mrf.mxu0 }
  0xf6   : > { %683 = vrot.lane.b32.xlu0 %v492_v11, %s1514_s30  ;;  %1077 = vmatpush.xpose.msk.msra.mxu3 %vm526_vm1, %v492_v11 }
  0xf9   : > { %1078 = vmatmul.msk.f32.vlgmr.msra.gmra.mxu3 %vm526_vm1, %v468_v12 }
  0xfd   : > { %760 = vrot.lane.b32.xlu2 %v468_v12, %s1512_s29  ;;  %601 = vrot.lane.b32.xlu1 %v468_v12, %s1513_s4 }
  0xfe   : > { %681 = vrot.lane.b32.xlu0 %v468_v12, %s1514_s30  ;;  %v519_v25 = vpop.f32.mrf.mxu2 }
  0xff   : > { %581 = vmatpush.msrb.mxu3 %v519_v25 }
 0x14f   : > { %v763_v18 = vpop.permute.xlu2 %762 }
 0x157   : > { %v761_v22 = vpop.permute.xlu2 %760 }
 0x167   : > { %v604_v17 = vpop.permute.xlu1 %603 }
 0x168   : > { %v684_v19 = vpop.permute.xlu0 %683  ;;  %1080 = vmatpush.xpose.msk.msrb.mxu0 %vm526_vm1, %v604_v17 }
 0x169   : > { %1083 = vmatpush.xpose.msk.msrb.mxu2 %vm526_vm1, %v684_v19 }
 0x16c   : > { %1086 = vmatpush.xpose.msk.msra.mxu0 %vm526_vm1, %v763_v18 }
 0x16f   : > { %v602_v20 = vpop.permute.xlu1 %601 }
 0x170   : > { %v682_v21 = vpop.permute.xlu0 %681  ;;  %1081 = vmatmul.msk.f32.vlgmr.msrb.gmra.mxu0 %vm526_vm1, %v602_v20 }
 0x171   : > { %1084 = vmatmul.msk.f32.vlgmr.msrb.gmra.mxu2 %vm526_vm1, %v682_v21 }
 0x178   : > { %1087 = vmatmul.msk.f32.vlgmr.msra.gmra.mxu0 %vm526_vm1, %v761_v22 }
 0x17c   : > { %v550_v23 = vpop.f32.mrf.mxu3 }
 0x17d   : > { %v553_v24 = vsel %vm526_vm1, %v550_v23, -inf }
 0x17e   : > { %554 = vmax.xlane.f32.xlu0 %v553_v24 }
 0x192   : > { %640 = vrot.lane.b32.xlu0 %v519_v25, %s1513_s4 }
 0x1ed   : > { %v626_v26 = vpop.f32.mrf.mxu0 }
 0x1ee   : > { %v629_v27 = vsel %vm526_vm1, %v626_v26, -inf }
 0x1ef   : > { %630 = vmax.xlane.f32.xlu1 %v629_v27 }
 0x1f1   : > { %v555_v28 = vpop.xlane.xlu0 %554 }
 0x1f2   : > { %v556_v29 = vsub.f32 %v550_v23, %v555_v28 }
 0x1f4   : > { %v557_v30 = vmul.f32 1.442695, %v556_v29  ;;  %v706_v31 = vpop.f32.mrf.mxu2 }
 0x1f5   : > { %v709_v32 = vsel %vm526_vm1, %v706_v31, -inf  ;;  %v785_v33 = vpop.f32.mrf.mxu0 }
 0x1f6   : > { %1200 = vpow2.f32 %v557_v30  ;;  %710 = vmax.xlane.f32.xlu2 %v709_v32  ;;  %v788_v36 = vsel %vm526_vm1, %v785_v33, -inf }
 0x1fc   : > { %v1201_v35 = vpop.eup %1200 }
 0x1fd   : > { %v562_v37 = vmul.f32 %v1201_v35, %v522_v34  ;;  %v559_v54 = vsel %vm526_vm1, %v1201_v35, 0.0 }
 0x1fe   : > { %789 = vmax.xlane.f32.xlu2 %v788_v36 }
 0x1ff   : > { %1079 = vmatmul.msk.f32.vlgmr.msrb.gmra.mxu3 %vm526_vm1, %v562_v37 }
 0x204   : > { %v641_v38 = vpop.permute.xlu0 %640 }
 0x205   : > { %661 = vmatpush.msrb.mxu1 %v641_v38 }
 0x208   : > { %719 = vrot.lane.b32.xlu1 %v519_v25, %s1514_s30 }
 0x216   : > { %798 = vrot.lane.b32.xlu2 %v519_v25, %s1512_s29 }
 0x262   : > { %v631_v39 = vpop.xlane.xlu1 %630 }
 0x263   : > { %v632_v40 = vsub.f32 %v626_v26, %v631_v39  ;;  %v859_v39 = vld [vmem:[#allocation13 + $0x18] sm:$0xff] }
 0x264   : > { %875 = vmatpush.msra.mxu2 %v859_v39 }
 0x265   : > { %v633_v41 = vmul.f32 1.442695, %v632_v40  ;;  %v858_v40 = vld [vmem:[#allocation13 + $0x10] sm:$0xff] }
 0x266   : > { %876 = vmatpush.msra.mxu2 %v858_v40 }
 0x267   : > { %1202 = vpow2.f32 %v633_v41  ;;  %v857_v41 = vld [vmem:[#allocation13 + $0x8] sm:$0xff] }
 0x268   : > { %877 = vmatpush.msra.mxu2 %v857_v41 }
 0x269   : > { %v711_v42 = vpop.xlane.xlu2 %710 }
 0x26a   : > { %v712_v43 = vsub.f32 %v706_v31, %v711_v42 }
 0x26c   : > { %v713_v45 = vmul.f32 1.442695, %v712_v43  ;;  %v856_v43 = vld [vmem:[#allocation13] sm:$0xff] }
 0x26d   : > { %v1203_v46 = vpop.eup %1202  ;;  %878 = vmatpush.msra.mxu2 %v856_v43 }
 0x26e   : > { %1204 = vpow2.f32 %v713_v45  ;;  %v635_v47 = vsel %vm526_vm1, %v1203_v46, 0.0  ;;  %v638_v48 = vmul.f32 %v1203_v46, %v523_v44 }
 0x26f   : > { %636 = vadd.xlane.f32.xlu0 %v635_v47 }
 0x270   : > { %1082 = vmatmul.msk.f32.vlgmr.msrb.gmra.mxu1 %vm526_vm1, %v638_v48 }
 0x271   : > { %v790_v49 = vpop.xlane.xlu2 %789 }
 0x272   : > { %v791_v50 = vsub.f32 %v785_v33, %v790_v49 }
 0x274   : > { %v1205_v51 = vpop.eup %1204  ;;  %v792_v52 = vmul.f32 1.442695, %v791_v50 }
 0x275   : > { %v715_v53 = vsel %vm526_vm1, %v1205_v51, 0.0  ;;  %v718_v57 = vmul.f32 %v1205_v51, %v524_v55 }
 0x276   : > { %1206 = vpow2.f32 %v792_v52  ;;  %716 = vadd.xlane.f32.xlu1 %v715_v53 }
 0x277   : > { %560 = vadd.xlane.f32.xlu0 %v559_v54 }
 0x279   : > { %v799_v56 = vpop.permute.xlu2 %798 }
 0x27a   : > { %819 = vmatpush.msra.mxu1 %v799_v56  ;;  %v720_v59 = vpop.permute.xlu1 %719 }
 0x27b   : > { %740 = vmatpush.msra.mxu3 %v720_v59 }
 0x27c   : > { %v1207_v60 = vpop.eup %1206  ;;  %1085 = vmatmul.msk.f32.vlgmr.msra.gmra.mxu3 %vm526_vm1, %v718_v57 }
 0x27d   : > { %v797_v61 = vmul.f32 %v1207_v60, %v525_v58  ;;  %v794_v62 = vsel %vm526_vm1, %v1207_v60, 0.0 }
 0x27e   : > { %795 = vadd.xlane.f32.xlu2 %v794_v62 }
 0x27f   : > { %1088 = vmatmul.msk.f32.vlgmr.msra.gmra.mxu1 %vm526_vm1, %v797_v61 }
 0x282   : > { %v583_v18 = vpop.f32.mrf.mxu3 }
 0x2e2   : > { %v637_v63 = vpop.xlane.xlu0 %636 }
 0x2e3   : > { %1208 = vrcp.f32 %v637_v63  ;;  %v677_v4 = vand.u32 2147483648, %v637_v63  ;;  %v675_v6 = vand.u32 2147483647, %v637_v63  ;;  %vm671_vm3 = vweird.f32 %v637_v63 }
 0x2e5   : > { %v678_v10 = vor.u32 1.1754944e-38, %v677_v4  ;;  %vm676_vm5 = vcmp.eq.f32.partialorder %v675_v6, 8.507059e+37 }
 0x2e9   : > { %v1209_v0 = vpop.eup %1208  ;;  %v717_v1 = vpop.xlane.xlu1 %716 }
 0x2ea   : > { %v667_v2 = vmul.f32 %v1209_v0, %v637_v63  ;;  %1210 = vrcp.f32 %v717_v1  ;;  %vm672_vm2 = vweird.f32 %v1209_v0  ;;  %v756_v22 = vand.u32 2147483648, %v717_v1  ;;  %v561_v42 = vpop.xlane.xlu0 %560 }
 0x2eb   : > { %vm673_vm4 = vmor %vm671_vm3, %vm672_vm2  ;;  %vm750_vm7 = vweird.f32 %v717_v1  ;;  %v754_v23 = vand.u32 2147483647, %v717_v1  ;;  %v597_v49 = vand.u32 2147483648, %v561_v42  ;;  %vm591_vm15 = vweird.f32 %v561_v42 }
 0x2ec   : > { %v668_v3 = vsub.f32 1.0, %v667_v2  ;;  %v757_v29 = vor.u32 1.1754944e-38, %v756_v22  ;;  %v595_v50 = vand.u32 2147483647, %v561_v42 }
 0x2ed   : > { %v663_v14 = vpop.f32.mrf.mxu1  ;;  %vm755_vm10 = vcmp.eq.f32.partialorder %v754_v23, 8.507059e+37  ;;  %v598_v52 = vor.u32 1.1754944e-38, %v597_v49 }
 0x2ee   : > { %v669_v5 = vmul.f32 %v1209_v0, %v668_v3  ;;  %vm596_vm3 = vcmp.eq.f32.partialorder %v595_v50, 8.507059e+37 }
 0x2f0   : > { %v1211_v7 = vpop.eup %1210  ;;  %v670_v8 = vadd.f32 %v1209_v0, %v669_v5 }
 0x2f1   : > { %v746_v9 = vmul.f32 %v1211_v7, %v717_v1  ;;  %v796_v11 = vpop.xlane.xlu2 %795  ;;  %vm751_vm6 = vweird.f32 %v1211_v7 }
 0x2f2   : > { %v674_v12 = vsel %vm673_vm4, %v1209_v0, %v670_v8  ;;  %1212 = vrcp.f32 %v796_v11  ;;  %vm752_vm8 = vmor %vm750_vm7, %vm751_vm6  ;;  %v835_v25 = vand.u32 2147483648, %v796_v11  ;;  %v833_v28 = vand.u32 2147483647, %v796_v11 }
 0x2f3   : > { %v747_v13 = vsub.f32 1.0, %v746_v9  ;;  %v679_v15 = vsel %vm676_vm5, %v678_v10, %v674_v12  ;;  %vm829_vm11 = vweird.f32 %v796_v11  ;;  %1214 = vrcp.f32 %v561_v42 }
 0x2f4   : > { %v680_v16 = vmul.f32 %v679_v15, %v663_v14  ;;  %v836_v33 = vor.u32 1.1754944e-38, %v835_v25  ;;  %vm834_vm13 = vcmp.eq.f32.partialorder %v833_v28, 8.507059e+37  ;;  %vm852_vm4 = vcmask 130048  }
 0x2f5   : > { %v748_v17 = vmul.f32 %v1211_v7, %v747_v13  ;;  %vm854_vm5 = vcmask 195584  }
 0x2f6   : > { %840 = vrot.lane.b32.xlu1 %v680_v16, %s1515_s1 }
 0x2f7   : > { %v749_v20 = vadd.f32 %v1211_v7, %v748_v17 }
 0x2f8   : > { %v1213_v19 = vpop.eup %1212 }
 0x2f9   : > { %v825_v21 = vmul.f32 %v1213_v19, %v796_v11  ;;  %v753_v26 = vsel %vm752_vm8, %v1211_v7, %v749_v20  ;;  %vm830_vm9 = vweird.f32 %v1213_v19  ;;  %v1215_v44 = vpop.eup %1214 }
 0x2fa   : > { %v758_v32 = vsel %vm755_vm10, %v757_v29, %v753_v26  ;;  %vm831_vm12 = vmor %vm829_vm11, %vm830_vm9  ;;  %v587_v45 = vmul.f32 %v1215_v44, %v561_v42  ;;  %vm592_vm14 = vweird.f32 %v1215_v44 }
 0x2fb   : > { %v826_v24 = vsub.f32 1.0, %v825_v21  ;;  %vm593_vm2 = vmor %vm591_vm15, %vm592_vm14 }
 0x2fc   : > { %v821_v36 = vpop.f32.mrf.mxu1  ;;  %v588_v46 = vsub.f32 1.0, %v587_v45 }
 0x2fd   : > { %v827_v27 = vmul.f32 %v1213_v19, %v826_v24 }
 0x2fe   : > { %v589_v47 = vmul.f32 %v1215_v44, %v588_v46 }
 0x2ff   : > { %v828_v30 = vadd.f32 %v1213_v19, %v827_v27  ;;  %v742_v31 = vpop.f32.mrf.mxu3 }
 0x300   : > { %v759_v34 = vmul.f32 %v758_v32, %v742_v31  ;;  %v590_v48 = vadd.f32 %v1215_v44, %v589_v47 }
 0x301   : > { %v832_v35 = vsel %vm831_vm12, %v1213_v19, %v828_v30 }
 0x302   : > { %v837_v37 = vsel %vm834_vm13, %v836_v33, %v832_v35  ;;  %844 = vrot.lane.b32.xlu0 %v759_v34, %s1516_s18  ;;  %v594_v51 = vsel %vm593_vm2, %v1215_v44, %v590_v48 }
 0x303   : > { %v838_v38 = vmul.f32 %v837_v37, %v821_v36  ;;  %v599_v53 = vsel %vm596_vm3, %v598_v52, %v594_v51 }
 0x304   : > { %v600_v55 = vmul.f32 %v599_v53, %v583_v18 }
 0x305   : > { %848 = vrot.lane.b32.xlu2 %v838_v38, %s1517_s19 }
 0x35f   : > { %v849_v58 = vpop.permute.xlu2 %848 }
 0x368   : > { %v841_v54 = vpop.permute.xlu1 %840 }
 0x369   : > { %v851_v56 = vsel %vm526_vm1, %v600_v55, %v841_v54 }
 0x374   : > { %v845_v57 = vpop.permute.xlu0 %844 }
 0x375   : > { %v853_v59 = vsel %vm852_vm4, %v851_v56, %v845_v57 }
 0x376   : > { %v855_v60 = vsel %vm854_vm5, %v853_v59, %v849_v58 }
 0x377   : > { %1089 = vmatmul.msk.f32.vlgmr.msra.gmra.mxu2 %vm447_vm0, %v855_v60 }
 0x3fa   : > { %v880_v61 = vpop.f32.mrf.mxu2 }
 0x3fb   : > { %883 = vst.msk [vmem:[%s439_s6] sm:$0xff] %vm447_vm0, %v880_v61 }
 0x3fc   : > { %1453 = shalt.err (!%p1450_p11)
}
 0x3fd   : > { %1117 = dma.vmem_to_hbm [thread:$0]  (%p1639_p4), %s898_s21, 128, %s900_s5, %s885_s17  }
 0x3fe PF: > { %s911_s20 = sand.u32 1, %s1492_s24   ;;  %p1887_p13 = scmp.ge.s32.totalorder %s1504_s27, 2 }
 0x3ff   : > { %s912_s23 = scalar_lea.sflag [#allocation4], %s911_s20 }
 0x400   : > { %p1143_p3 = pnand %p1887_p13, %p1643_p5 }
 0x402   : > { %p1144_p7 = pneg %p1143_p3 }
 0x404   : > { %1487 = dma.done.wait (%p1144_p7), %s912_s23, 128  }
 0x405   : > { %1489 = vsyncadd (%p1144_p7), %s912_s23, 4294967168  ;;  %s1888_s27 = sld [smem:[#allocation21_spill]]  ;;  %s1891_s24 = smov %s1496_s25 }
 0x406   : > { %s1889_s29 = sld [smem:[#allocation20_spill]] }
 0x407   : > { %s1890_s26 = sld [smem:[#allocation22_spill]] }
 0x40b   : > { %p25_p9 = scmp.ge.s32.totalorder %s1888_s27, 4  }
 0x40c   : > { %s1892_s25 = smov %s1889_s29 }
 0x40d   :  { %27 = sbr.rel (!%p25_p9) target bundleno = 15 (0xf), region = 133 }
 0x412   :  { %918 = vsyncpa [#allocation3], 1 }
 0x413   :  { %920 = vsyncpa [#allocation3 + $0x1], 1 }
 0x414   :  { %921 = vsyncpa [#allocation6], 1 }
 0x415   :  { %923 = vsyncpa [#allocation6 + $0x1], 1 }
 0x416   :  { %924 = vsyncpa [#allocation9], 1 }
 0x417   :  { %925 = vsyncpa [#allocation12], 1 }
 0x418   :  { %926 = vsyncpa [#allocation4], 1 }
 0x419   :  { %928 = vsyncpa [#allocation4 + $0x1], 1 }

</bundles_post_ra>
